<compile_context>
chip_gen: v6e
topology: v6e:2x2x1
jax: 0.10.0
libtpu: 0.0.40
codegen_flags: <defaults>
</compile_context>

<pallas_src>
import jax
import jax.numpy as jnp
from jax.experimental import pallas as pl
from jax.experimental.pallas import tpu as pltpu

_NEG_BIG = -1e30  # neutralizer for padded sequence lanes / padded batch rows


def _round_up(x, m):
    return ((x + m - 1) // m) * m


def _choose_block_b(B):
    # Prefer >= 8 rows per grid step for DMA granularity, but keep the grid
    # length >= 2 whenever possible so v7x megacore can shard the batch axis.
    if B >= 16:
        return 8
    if B >= 2:
        return max(1, B // 2)
    return 1


def attn_step_kernel(dec_ref, eng_ref, mask_ref, out_ref):
    # dec_ref:  (Bt, 1, H)      compute dtype (bf16 by default)
    # eng_ref:  (Bt, H, S_pad)  compute dtype; precomputed enc @ W^T + b (padded, transposed)
    # mask_ref: (Bt, 1, S_pad)  f32; padded lanes already carry -1e30
    # out_ref:  (Bt, 1, S_pad)  f32
    scores = jnp.einsum(
        "bqh,bhs->bqs", dec_ref[...], eng_ref[...],
        preferred_element_type=jnp.float32)               # MXU, f32 accumulate
    e = scores + mask_ref[...]
    m = jnp.max(e, axis=-1, keepdims=True)
    shifted = e - m
    lse = jnp.log(jnp.sum(jnp.exp(shifted), axis=-1, keepdims=True))
    out_ref[...] = (shifted - lse).astype(out_ref.dtype)


def attn_setup(enc_outs, mask_tensor, weight, bias=None,
               compute_dtype=jnp.bfloat16, block_b=None):
    """Once-per-sequence precompute (hoisted out of the per-decoder-step path).

    Returns (energy_t, mask_p, block_b):
      energy_t: (B_pad, H, S_pad) in compute_dtype = pad(enc @ W^T + b) transposed
      mask_p:   (B_pad, 1, S_pad) f32 additive mask, padded lanes at -1e30
    """
    B, S, H = enc_outs.shape
    bt = _choose_block_b(B) if block_b is None else block_b
    B_pad = _round_up(B, bt)
    S_pad = max(128, _round_up(S, 128))

    # Step-invariant projection: energy_t[b, o, s] = sum_h enc[b, s, h] * W[o, h] + bias[o].
    # Plain XLA GEMM, executed once per sequence; the per-step Pallas kernel only
    # consumes the result.  Folding the bias here keeps pre-softmax energies exact
    # vs PyTorch at zero per-step cost (log_softmax removes it anyway).
    energy_t = jnp.einsum("bsh,oh->bos", enc_outs.astype(jnp.float32),
                          weight.astype(jnp.float32))
    if bias is not None:
        energy_t = energy_t + bias.astype(jnp.float32)[None, :, None]
    energy_t = jnp.pad(energy_t, ((0, B_pad - B), (0, 0), (0, S_pad - S)))
    energy_t = energy_t.astype(compute_dtype)

    # Additive mask built once: module-provided mask in valid lanes, -1e30 in
    # padded sequence lanes / padded batch rows so they vanish from the logsumexp.
    mask_p = jnp.pad(mask_tensor.astype(jnp.float32),
                     ((0, B_pad - B), (0, S_pad - S)),
                     constant_values=_NEG_BIG).reshape(B_pad, 1, S_pad)
    return energy_t, mask_p, bt


def attn_step(dec_out, energy_t, mask_p, block_b, seq_len,
              compute_dtype=jnp.bfloat16):
    """Per-decoder-step attention: (B, 1, H) query vs precomputed energies."""
    B = dec_out.shape[0]
    B_pad, H, S_pad = energy_t.shape
    bt = block_b
    grid_b = B_pad // bt

    dec3 = dec_out.astype(compute_dtype).reshape(B, 1, H)
    if B_pad != B:
        dec3 = jnp.pad(dec3, ((0, B_pad - B), (0, 0), (0, 0)))

    itemsize = jnp.dtype(compute_dtype).itemsize
    # Double-buffered per-step VMEM footprint + slack; explicit so v7x's 64 MiB
    # VMEM keeps double buffering alive (defaults differ per generation).
    step_bytes = bt * (H * itemsize + H * S_pad * itemsize + 2 * S_pad * 4)
    vmem_limit = int(min(max(2 * step_bytes + (2 << 20), 16 << 20), 48 << 20))

    # TODO(synk): if profiling on v5e/v6e shows exposed DMA at grid-step
    # boundaries, add pipeline_mode=pl.Buffered(3) to the energy BlockSpec
    # (plenty of VMEM headroom there); keep the default 2 on v7x.
    out = pl.pallas_call(
        attn_step_kernel,
        out_shape=jax.ShapeDtypeStruct((B_pad, 1, S_pad), jnp.float32),
        grid_spec=pltpu.PrefetchScalarGridSpec(
            num_scalar_prefetch=0,
            grid=(grid_b,),
            in_specs=[
                pl.BlockSpec((bt, 1, H), lambda b: (b, 0, 0)),        # dec rows
                pl.BlockSpec((bt, H, S_pad), lambda b: (b, 0, 0)),    # energy rows
                pl.BlockSpec((bt, 1, S_pad), lambda b: (b, 0, 0)),    # mask rows
            ],
            out_specs=pl.BlockSpec((bt, 1, S_pad), lambda b: (b, 0, 0)),
        ),
        compiler_params=pltpu.CompilerParams(
            dimension_semantics=("parallel",),   # megacore on v7x; free on v5e/v6e
            vmem_limit_bytes=vmem_limit,
        ),
    )(dec3, energy_t, mask_p)

    return out.reshape(B_pad, S_pad)[:B, :seq_len]


def attn_forward(dec_out, enc_outs, mask_tensor, weight, bias=None,
                 compute_dtype=jnp.bfloat16):
    """One-shot wrapper matching Attn.forward(dec_out, enc_outs, mask_tensor).

    When Attn runs once per decoder step, call attn_setup() once per sequence and
    attn_step() per step so the projection / pad / cast is never redone per step.
    """
    B, S, H = enc_outs.shape
    energy_t, mask_p, bt = attn_setup(enc_outs, mask_tensor, weight, bias,
                                      compute_dtype=compute_dtype)
    return attn_step(dec_out, energy_t, mask_p, bt, S,
                     compute_dtype=compute_dtype)


def attn_reference(dec_out, enc_outs, mask_tensor, weight, bias):
    # Pure-JAX reference mirroring the PyTorch forward exactly (incl. bias).
    energy = jnp.einsum("bsh,oh->bso", enc_outs, weight) + bias       # Linear
    energy = jnp.transpose(energy, (0, 2, 1))                         # (B, H, S)
    attn_energy = jnp.einsum("bqh,bhs->bqs", dec_out, energy)[:, 0, :]
    attn_energy = attn_energy + mask_tensor
    return jax.nn.log_softmax(attn_energy, axis=1)


if __name__ == "__main__":
    B, S, H = 2, 8, 32
    key = jax.random.PRNGKey(0)
    k_dec, k_enc, k_mask, k_w, k_b = jax.random.split(key, 5)

    # Deterministic synthetic parameters (PyTorch Linear init range: +-1/sqrt(H))
    bound = 1.0 / jnp.sqrt(jnp.float32(H))
    weight = jax.random.uniform(k_w, (H, H), jnp.float32, -bound, bound)
    bias = jax.random.uniform(k_b, (H,), jnp.float32, -bound, bound)

    dec_out = jax.random.normal(k_dec, (B, 1, H), jnp.float32)
    enc_outs = jax.random.normal(k_enc, (B, S, H), jnp.float32)
    # mask: zeros for valid positions, large negative for masked positions
    mask_tensor = jnp.where(
        jax.random.uniform(k_mask, (B, S)) > 0.25, 0.0, -1e9
    ).astype(jnp.float32)

    ref = attn_reference(dec_out, enc_outs, mask_tensor, weight, bias)

    # f32 compute path: tight tolerance vs the f32 reference.
    out_f32 = jax.block_until_ready(
        attn_forward(dec_out, enc_outs, mask_tensor, weight, bias,
                     compute_dtype=jnp.float32))
    assert out_f32.shape == (B, S)
    assert jnp.allclose(out_f32, ref, atol=1e-4, rtol=1e-4), "f32 mismatch vs reference"

    # Default bf16 compute path (halves per-step HBM traffic): bf16-level tolerance.
    out_bf16 = jax.block_until_ready(
        attn_forward(dec_out, enc_outs, mask_tensor, weight, bias))
    assert out_bf16.shape == (B, S)
    assert jnp.allclose(out_bf16, ref, atol=5e-2, rtol=5e-2), "bf16 mismatch vs reference"

    print("KERNEL_OK")
</pallas_src>

<mosaic_0001>
module attributes {stable_mosaic.version = 11 : i64} {
  func.func @attn_step_kernel(%arg0: i32, %arg1: memref<1x1x32xf32, #tpu.memory_space<vmem>>, %arg2: memref<1x32x128xf32, #tpu.memory_space<vmem>>, %arg3: memref<1x1x128xf32, #tpu.memory_space<vmem>>, %arg4: memref<1x1x128xf32, #tpu.memory_space<vmem>>) attributes {dimension_semantics = [#tpu.dimension_semantics<parallel>], iteration_bounds = array<i64: 2>, scalar_prefetch = 0 : i64, scratch_operands = 0 : i64, tpu.core_type = #tpu.core_type<tc>, window_params = [{transform_indices = @transform_0, window_bounds = array<i64: 1, 1, 32>}, {transform_indices = @transform_1, window_bounds = array<i64: 1, 32, 128>}, {transform_indices = @transform_2, window_bounds = array<i64: 1, 1, 128>}, {transform_indices = @transform_3, window_bounds = array<i64: 1, 1, 128>}]} {
    %c0 = arith.constant 0 : index
    %c0_0 = arith.constant 0 : index
    %c0_1 = arith.constant 0 : index
    %0 = vector.load %arg1[%c0, %c0_0, %c0_1] : memref<1x1x32xf32, #tpu.memory_space<vmem>>, vector<1x1x32xf32>
    %c0_2 = arith.constant 0 : index
    %c0_3 = arith.constant 0 : index
    %c0_4 = arith.constant 0 : index
    %1 = vector.load %arg2[%c0_2, %c0_3, %c0_4] : memref<1x32x128xf32, #tpu.memory_space<vmem>>, vector<1x32x128xf32>
    "tpu.trace_start"() <{level = 10 : i32, message = "bqh,bhs->bqs"}> : () -> ()
    %cst = arith.constant dense<0.000000e+00> : vector<1x1x128xf32>
    %2 = tpu.matmul %0, %1, %cst {dimension_numbers = #tpu.dot_dimension_numbers<[2], [1], [1], [2], [0, 0, 0, 1, 1, 2], [0], [0]>} : vector<1x1x32xf32>, vector<1x32x128xf32>, vector<1x1x128xf32> -> vector<1x1x128xf32>
    "tpu.trace_stop"() : () -> ()
    %c0_5 = arith.constant 0 : index
    %c0_6 = arith.constant 0 : index
    %c0_7 = arith.constant 0 : index
    %3 = vector.load %arg3[%c0_5, %c0_6, %c0_7] : memref<1x1x128xf32, #tpu.memory_space<vmem>>, vector<1x1x128xf32>
    %4 = arith.addf %2, %3 : vector<1x1x128xf32>
    %cst_8 = arith.constant dense<0xFF800000> : vector<1x1xf32>
    %5 = vector.multi_reduction <maximumf>, %4, %cst_8 [2] : vector<1x1x128xf32> to vector<1x1xf32>
    %6 = vector.shape_cast %5 : vector<1x1xf32> to vector<1x1x1xf32>
    %7 = vector.broadcast %6 : vector<1x1x1xf32> to vector<1x1x128xf32>
    %8 = arith.subf %4, %7 : vector<1x1x128xf32>
    %9 = math.exp %8 : vector<1x1x128xf32>
    %cst_9 = arith.constant dense<0.000000e+00> : vector<1x1xf32>
    %10 = vector.multi_reduction <add>, %9, %cst_9 [2] : vector<1x1x128xf32> to vector<1x1xf32>
    %11 = vector.shape_cast %10 : vector<1x1xf32> to vector<1x1x1xf32>
    %12 = math.log %11 : vector<1x1x1xf32>
    %13 = vector.broadcast %12 : vector<1x1x1xf32> to vector<1x1x128xf32>
    %14 = arith.subf %8, %13 : vector<1x1x128xf32>
    %c0_10 = arith.constant 0 : index
    %c0_11 = arith.constant 0 : index
    %c0_12 = arith.constant 0 : index
    %15 = vector.load %arg4[%c0_10, %c0_11, %c0_12] : memref<1x1x128xf32, #tpu.memory_space<vmem>>, vector<1x1x128xf32>
    tpu.vector_store %arg4[%c0_10, %c0_11, %c0_12], %14 {strides = array<i32>} : memref<1x1x128xf32, #tpu.memory_space<vmem>>, vector<1x1x128xf32>,
    return
  }
  func.func @transform_0(%arg0: i32) -> (i32, i32, i32) {
    %c0_i32 = arith.constant 0 : i32
    %c0_i32_0 = arith.constant 0 : i32
    %c0_i32_1 = arith.constant 0 : i32
    return %arg0, %c0_i32, %c0_i32_0 : i32, i32, i32
  }
  func.func @transform_1(%arg0: i32) -> (i32, i32, i32) {
    %c0_i32 = arith.constant 0 : i32
    %c0_i32_0 = arith.constant 0 : i32
    %c0_i32_1 = arith.constant 0 : i32
    return %arg0, %c0_i32, %c0_i32_0 : i32, i32, i32
  }
  func.func @transform_2(%arg0: i32) -> (i32, i32, i32) {
    %c0_i32 = arith.constant 0 : i32
    %c0_i32_0 = arith.constant 0 : i32
    %c0_i32_1 = arith.constant 0 : i32
    return %arg0, %c0_i32, %c0_i32_0 : i32, i32, i32
  }
  func.func @transform_3(%arg0: i32) -> (i32, i32, i32) {
    %c0_i32 = arith.constant 0 : i32
    %c0_i32_0 = arith.constant 0 : i32
    %c0_i32_1 = arith.constant 0 : i32
    return %arg0, %c0_i32, %c0_i32_0 : i32, i32, i32
  }
}

</mosaic_0001>

<bundles_post_ra>
// kernel: tpu_custom_call.1
= control target key start
LH: loop header
LB: loop body
LE: loop exit
PB: predicated region body
PF: predicated region fallthrough
CT: control target
= control target key end

     0   :  { %8 = vsyncpa [#allocation3], 0  ;;  %s883_s0 = inlined_call_operand.hbm [shape: f32[2,1,32], index: 0, kind: input, shape index: {}]   ;;  %s884_s1 = inlined_call_operand.hbm [shape: f32[2,32,128], index: 1, kind: input, shape index: {}]   ;;  %s885_s2 = inlined_call_operand.vmem [shape: f32[2,1,128], index: 2, kind: input, shape index: {}]   ;;  %s886_s3 = inlined_call_operand.hbm [shape: f32[2,1,128], index: 3, kind: output, shape index: {}]  }
   0x1   :  { %10 = vsyncpa [#allocation3 + $0x1], 0 }
   0x2   :  { %11 = vsyncpa [#allocation6], 0 }
   0x3   :  { %13 = vsyncpa [#allocation6 + $0x1], 0 }
   0x4   :  { %14 = vsyncpa [#allocation4], 0 }
   0x5   :  { %16 = vsyncpa [#allocation4 + $0x1], 0  ;;  %s680_s12 = smov 0   ;;  %s682_s13 = smov 0  }
   0x6   :  { %s684_s14 = smov 0   ;;  %s686_s15 = smov 0  }
   0x7 LB: > { %s701_s16 = sadd.s32 4294967295, %s651_s15   ;;  %s438_s17 = sadd.s32 4294967294, %s651_s15   ;;  %s651_s15 = sphi %s686_s15, %s904_s15   ;;  %s647_s14 = sphi %s684_s14, %s903_s14   ;;  %s643_s13 = sphi %s682_s13, %s902_s13   ;;  %s639_s12 = sphi %s680_s12, %s901_s12  }
   0x8   : > { %s705_s18 = sadd.s32 1, %s651_s15   ;;  %s29_s19 = sadd.s32 1, %s647_s14 }
   0x9   : > { %s26_s20 = ssub.s32 %s651_s15, %s705_s18  ;;  %p36_p0 = scmp.ne.s32.totalorder %s647_s14, %s643_s13 }
   0xa   : > { %p27_p1 = scmp.eq.s32.totalorder %s26_s20, 0  ;;  %p37_p2 = scmp.eq.s32.totalorder %s651_s15, 0 }
   0xb   : > { %p42_p3 = scmp.ne.s32.totalorder %s643_s13, %s639_s12  ;;  %p43_p4 = scmp.eq.s32.totalorder %s701_s16, 0 }
   0xc   : > { %s717_s21 = scalar_select %p27_p1, %s647_s14, %s29_s19  }
   0xd   : > { %p719_p5 = por %p37_p2, %p36_p0  ;;  %p723_p6 = por %p43_p4, %p42_p3 }
   0xe   : > { %p118_p7 = scmp.eq.s32.totalorder %s701_s16, 1  ;;  %p124_p8 = scmp.eq.s32.totalorder %s438_s17, 1 }
   0xf   : > { %s890_s23 = scalar_select %p723_p6, 1, 0 }
  0x10   : > { %p485_p10 = scmp.lt.s32.totalorder %s651_s15, 2  ;;  %p730_p11 = por %p118_p7, %p36_p0 }
  0x11   : > { %p734_p12 = por %p124_p8, %p42_p3  ;;  %s739_s26 = sand.u32 1, %s647_s14  }
  0x12   : > { %s891_s24 = scalar_select %p730_p11, 1, 0 }
  0x13   : > { %s892_s25 = scalar_select %p734_p12, 1, 0 }
  0x14   : > { %s441_s27 = sshll.u32 %s651_s15, 4  ;;  %s147_s4 = scalar_lea.vmem [#allocation2], %s739_s26 }
  0x15   : > { %s745_s30 = scalar_lea.hbm %s883_s0, %s441_s27  ;;  %s154_s5 = sshll.u32 %s147_s4, 4  ;;  %s748_s5 = int_to_ptr.vmem [resolvable:$true] %s154_s5 }
  0x16   : > { %p752_p13 = pnand %p485_p10, %p719_p5  ;;  %s145_s7 = scalar_lea.sflag [#allocation3], %s739_s26 }
  0x17   : > { %s527_s8 = scalar_lea.hbm %s745_s30, 16  ;;  %s532_s11 = scalar_lea.hbm %s883_s0, 32 }
  0x18   : > { %p528_p2 = scmp.ne.s32.totalorder %s745_s30, %s527_s8  ;;  %p529_p3 = pneg %p752_p13 }
  0x19   : > { %p533_p5 = scmp.lt.s32.totalorder %s745_s30, %s883_s0  ;;  %p534_p8 = scmp.lt.s32.totalorder %s532_s11, %s527_s8 }
  0x1a   : > { %p530_p4 = pnand %p529_p3, %p528_p2 }
  0x1b   : > { %p535_p10 = por %p534_p8, %p533_p5 }
  0x1c   : > { %p531_p7 = pneg %p530_p4 }
  0x1e   : > { %p536_p9 = pnand %p535_p10, %p531_p7 }
  0x20   : > { %539 = shalt.err (!%p536_p9)
}
  0x21   : > { %s540_s20 = scalar_lea.vmem %s748_s5, 16  ;;  %s653_s22 = smov [#allocation2]  }
  0x22   : > { %p541_p0 = scmp.ne.s32.totalorder %s748_s5, %s540_s20  ;;  %s545_s27 = sshll.u32 %s653_s22, 4  ;;  %s546_s27 = int_to_ptr.vmem [resolvable:$false] %s545_s27 }
  0x23   : > { %s547_s28 = scalar_lea.vmem %s546_s27, 32  ;;  %p548_p1 = scmp.lt.s32.totalorder %s748_s5, %s546_s27 }
  0x24   : > { %p543_p2 = pnand %p541_p0, %p529_p3  ;;  %p549_p12 = scmp.lt.s32.totalorder %s547_s28, %s540_s20 }
  0x26   : > { %p544_p4 = pneg %p543_p2  ;;  %p550_p11 = por %p549_p12, %p548_p1 }
  0x28   : > { %p551_p5 = pnand %p550_p11, %p544_p4 }
  0x2a   : > { %554 = shalt.err (!%p551_p5)
}
  0x2b   : > { %477 = dma.hbm_to_vmem [thread:$0]  (!%p752_p13), %s745_s30, 16, %s748_s5, %s145_s7  }
  0x2c   : > { %p894_p9 = scmp.lt.s32.totalorder %s651_s15, 3  ;;  %p895_p0 = scmp.ge.s32.totalorder %s651_s15, 1 }
  0x2d   : > { %s442_s4 = sshll.u32 %s739_s26, 5  ;;  %s451_s8 = sshll.u32 %s651_s15, 9 }
  0x2e   : > { %p787_p7 = pnand %p895_p0, %p894_p9  ;;  %s796_s11 = scalar_lea.hbm %s884_s1, %s451_s8 }
  0x2f   : > { %s165_s17 = scalar_lea.vmem [#allocation5], %s442_s4  ;;  %s162_s30 = scalar_lea.sflag [#allocation6], %s739_s26 }
  0x30   : > { %s172_s19 = sshll.u32 %s165_s17, 4  ;;  %s555_s5 = scalar_lea.hbm %s796_s11, 512  ;;  %s798_s19 = int_to_ptr.vmem [resolvable:$true] %s172_s19 }
  0x31   : > { %p556_p11 = scmp.ne.s32.totalorder %s796_s11, %s555_s5  ;;  %s560_s22 = scalar_lea.hbm %s884_s1, 1024 }
  0x32   : > { %p561_p8 = scmp.lt.s32.totalorder %s796_s11, %s884_s1  ;;  %p562_p10 = scmp.lt.s32.totalorder %s560_s22, %s555_s5 }
  0x33   : > { %p558_p12 = pnand %p556_p11, %p529_p3 }
  0x34   : > { %p563_p2 = por %p562_p10, %p561_p8 }
  0x35   : > { %p559_p1 = pneg %p558_p12 }
  0x37   : > { %p564_p4 = pnand %p563_p2, %p559_p1 }
  0x39   : > { %567 = shalt.err (!%p564_p4)
}
  0x3a   : > { %s568_s4 = scalar_lea.vmem %s798_s19, 512  ;;  %s654_s8 = smov [#allocation5]  }
  0x3b   : > { %p569_p5 = scmp.ne.s32.totalorder %s798_s19, %s568_s4  ;;  %s573_s9 = sshll.u32 %s654_s8, 4  ;;  %s574_s9 = int_to_ptr.vmem [resolvable:$false] %s573_s9 }
  0x3c   : > { %s575_s10 = scalar_lea.vmem %s574_s9, 1024  ;;  %p576_p11 = scmp.lt.s32.totalorder %s798_s19, %s574_s9 }
  0x3d   : > { %p571_p9 = pnand %p569_p5, %p529_p3  ;;  %p577_p12 = scmp.lt.s32.totalorder %s575_s10, %s568_s4 }
  0x3f   : > { %p572_p0 = pneg %p571_p9  ;;  %p578_p6 = por %p577_p12, %p576_p11 }
  0x41   : > { %p579_p8 = pnand %p578_p6, %p572_p0 }
  0x43   : > { %582 = shalt.err (!%p579_p8)
}
  0x44   : > { %s655_s17 = smov 128   ;;  %s656_s5 = smov 8  }
  0x45   : > { %480 = dma.hbm_to_vmem [thread:$0]  (!%p752_p13), %s796_s11, 512, %s798_s19, %s162_s30, %s655_s17, %s655_s17, %s656_s5  }
  0x46   : > { %190 = sbr.rel (%p787_p7) target bundleno = 610 (0x262), region = 32  ;;  %s828_s7 = sand.u32 (!%p787_p7), 1, %s643_s13  }
  0x47   : > { %s193_s20 = scalar_lea.sflag (!%p787_p7), [#allocation3], %s828_s7  ;;  %s195_s22 = scalar_lea.vmem (!%p787_p7), [#allocation2], %s828_s7 }
  0x48   : > { %p897_p6 = scmp.ne.s32.totalorder (!%p787_p7), %s890_s23, 0 }
  0x4b   : > { %626 = dma.done.wait (%p897_p6), %s193_s20, 16  }
  0x4c   : > { %628 = vsyncadd (%p897_p6), %s193_s20, 4294967280  ;;  %s446_s26 = sshll.u32 %s828_s7, 5  ;;  %s201_s6 = scalar_lea.sflag [#allocation6], %s828_s7 }
  0x4d   : > { %s204_s29 = scalar_lea.vmem [#allocation5], %s446_s26 }
  0x4e   : > { %630 = dma.done.wait (%p897_p6), %s201_s6, 512  }
  0x4f   : > { %632 = vsyncadd (%p897_p6), %s201_s6, 4294966784  ;;  %v657_v0 = vmov 0.0   ;;  %vm658_vm0 = vmmov 0   ;;  %v240_v1 = vld [vmem:[%s204_s29 + $0x18] sm:$0xff]  ;;  %v239_v2 = vld [vmem:[%s204_s29 + $0x10] sm:$0xff]  ;;  %vm242_vm1 = vcmask 261120  }
  0x50   : > { %457 = vmatprep.subr.mxu0 %v657_v0  ;;  %465 = vmatprep.mubr.msk.f32.mxu0 %vm658_vm0, %v657_v0  ;;  %v238_v3 = vld [vmem:[%s204_s29 + $0x8] sm:$0xff]  ;;  %v237_v4 = vld [vmem:[%s204_s29] sm:$0xff]  ;;  %v236_v5 = vld [vmem:[%s195_s22] sm:$0x1]  ;;  %p233_p13 = scmp.lt.s32.totalorder %s701_s16, 1  ;;  %vm316_vm2 = vcmask 1040384  }
  0x51   : > { %458 = vmatpush3.msra.mxu0 %v240_v1  ;;  %s448_s27 = sshll.u32 %s701_s16, 4  ;;  %s232_s28 = scalar_lea.vmem [#allocation7], %s828_s7 }
  0x52   : > { %459 = vmatprep.subr.mxu0 %v657_v0  ;;  %s234_s23 = scalar_select %p233_p13, %s701_s16, 1 }
  0x53   : > { %460 = vmatpush3.msra.mxu0 %v239_v2  ;;  %s343_s4 = sshll.u32 %s232_s28, 4  ;;  %s341_s10 = scalar_lea.hbm %s886_s3, %s448_s27  ;;  %s344_s4 = int_to_ptr.vmem [resolvable:$true] %s343_s4 }
  0x54   : > { %461 = vmatprep.subr.mxu0 %v657_v0  ;;  %s235_s30 = scalar_lea.vmem %s885_s2, %s234_s23  ;;  %s331_s17 = scalar_lea.sflag [#allocation4], %s828_s7 }
  0x55   : > { %462 = vmatpush3.msra.mxu0 %v238_v3  ;;  %v241_v6 = vld [vmem:[%s235_s30] sm:$0x1]  ;;  %s583_s5 = scalar_lea.vmem %s344_s4, 16  ;;  %p898_p7 = scmp.ne.s32.totalorder %s891_s24, 0 }
  0x56   : > { %463 = vmatprep.subr.mxu0 %v657_v0  ;;  %p584_p3 = scmp.ne.s32.totalorder %s344_s4, %s583_s5  ;;  %s659_s20 = smov [#allocation7]  }
  0x57   : > { %464 = vmatpush3.msra.mxu0 %v237_v4  ;;  %s587_s22 = sshll.u32 %s659_s20, 4  ;;  %s588_s22 = int_to_ptr.vmem [resolvable:$false] %s587_s22 }
  0x58   : > { %466 = vmatmul.mubr.msk.f32.vlgmr.msra.gmra.mxu0 %vm242_vm1, %v236_v5  ;;  %p585_p1 = pnand %p584_p3, %p898_p7  ;;  %s589_s16 = scalar_lea.vmem %s588_s22, 32 }
  0x59   : > { %p590_p2 = scmp.lt.s32.totalorder %s344_s4, %s588_s22  ;;  %p591_p4 = scmp.lt.s32.totalorder %s589_s16, %s583_s5 }
  0x5a   : > { %p586_p10 = pneg %p585_p1 }
  0x5b   : > { %p592_p5 = por %p591_p4, %p590_p2 }
  0x5d   : > { %p593_p9 = pnand %p592_p5, %p586_p10 }
 0x118   : > { %v312_v7 = vpop.f32.mrf.mxu0 }
 0x119   : > { %v313_v8 = vadd.f32 %v312_v7, %v241_v6 }
 0x11a   : > { %v467_v9 = vpop.f32.mrf.mxu0 }
 0x11b   : > { %v317_v10 = vsel %vm316_vm2, %v313_v8, -inf }
 0x11c   : > { %318 = vmax.xlane.f32.xlu0 %v317_v10 }
 0x1a5   : > { %v319_v11 = vpop.xlane.xlu0 %318 }
 0x1a6   : > { %v320_v12 = vsub.f32 %v313_v8, %v319_v11 }
 0x1a8   : > { %v321_v13 = vmul.f32 1.442695, %v320_v12 }
 0x1aa   : > { %523 = vpow2.f32 %v321_v13 }
 0x1b7   : > { %v524_v14 = vpop.eup %523 }
 0x1b8   : > { %v323_v15 = vsel %vm316_vm2, %v524_v14, 0.0 }
 0x1b9   : > { %324 = vadd.xlane.f32.xlu0 %v323_v15 }
 0x242   : > { %v325_v16 = vpop.xlane.xlu0 %324 }
 0x243   : > { %525 = vlog2.f32 %v325_v16 }
 0x250   : > { %v526_v17 = vpop.eup %525 }
 0x251   : > { %v327_v18 = vmul.f32 0.6931472, %v526_v17 }
 0x253   : > { %v328_v19 = vsub.f32 %v320_v12, %v327_v18 }
 0x255   : > { %329 = vst [vmem:[%s232_s28] sm:$0x1] %v328_v19 }
 0x256   : > { %596 = shalt.err (!%p593_p9)
}
 0x257   : > { %s597_s26 = scalar_lea.hbm %s341_s10, 16  ;;  %s601_s29 = scalar_lea.hbm %s886_s3, 32 }
 0x258   : > { %p598_p0 = scmp.ne.s32.totalorder %s341_s10, %s597_s26  ;;  %p602_p8 = scmp.lt.s32.totalorder %s341_s10, %s886_s3 }
 0x259   : > { %p603_p6 = scmp.lt.s32.totalorder %s601_s29, %s597_s26 }
 0x25a   : > { %p599_p11 = pnand %p598_p0, %p898_p7 }
 0x25b   : > { %p604_p13 = por %p603_p6, %p602_p8 }
 0x25c   : > { %p600_p12 = pneg %p599_p11 }
 0x25e   : > { %p605_p3 = pnand %p604_p13, %p600_p12 }
 0x260   : > { %608 = shalt.err (!%p605_p3)
}
 0x261   : > { %472 = dma.vmem_to_hbm [thread:$0]  (%p898_p7), %s344_s4, 16, %s341_s10, %s331_s17  }
 0x262 PF: > { %s355_s19 = sand.u32 1, %s639_s12   ;;  %p899_p1 = scmp.ne.s32.totalorder %s892_s25, 0 }
 0x263   : > { %p900_p10 = scmp.ge.s32.totalorder %s651_s15, 2  ;;  %s356_s30 = scalar_lea.sflag [#allocation4], %s355_s19 }
 0x265   : > { %p482_p2 = pnand %p900_p10, %p899_p1 }
 0x267   : > { %p483_p4 = pneg %p482_p2 }
 0x269   : > { %634 = dma.done.wait (%p483_p4), %s356_s30, 16  }
 0x26a   : > { %636 = vsyncadd (%p483_p4), %s356_s30, 4294967280  ;;  %p19_p5 = scmp.ge.s32.totalorder %s705_s18, 4   ;;  %s901_s12 = smov %s643_s13 }
 0x26b   : > { %s902_s13 = smov %s647_s14  ;;  %s903_s14 = smov %s717_s21 }
 0x26c   : > { %s904_s15 = smov %s705_s18  ;;  %21 = sbr.rel (!%p19_p5) target bundleno = 7 (0x7), region = 93 }
 0x271   :  { %360 = vsyncpa [#allocation3], 1 }
 0x272   :  { %362 = vsyncpa [#allocation3 + $0x1], 1 }
 0x273   :  { %363 = vsyncpa [#allocation6], 1 }
 0x274   :  { %365 = vsyncpa [#allocation6 + $0x1], 1 }
 0x275   :  { %366 = vsyncpa [#allocation4], 1 }
 0x276   :  { %368 = vsyncpa [#allocation4 + $0x1], 1 }

</bundles_post_ra>
